<compile_context>
chip_gen: v7x
topology: tpu7x:2x2x1
jax: 0.10.0
libtpu: 0.0.40
codegen_flags: <defaults>
</compile_context>

<pallas_src>
import functools

import jax
import jax.numpy as jnp
from jax import lax
from jax.experimental import pallas as pl
from jax.experimental.pallas import tpu as pltpu

NGF = 64


def _round_up(x, m):
    return (x + m - 1) // m * m


# ----------------------- batched tiled matmul (MXU path) ---------------------

def _mm_kernel(a_ref, b_ref, bias_ref, o_ref, acc_ref, *, in_act, out_act):
    k = pl.program_id(3)

    @pl.when(k == 0)
    def _():
        acc_ref[...] = jnp.zeros_like(acc_ref)

    a = a_ref[0]                                   # (tm, tk) bf16
    if in_act == "leaky_relu":
        a = jnp.where(a >= 0, a, 0.2 * a)
    elif in_act == "relu":
        a = jnp.maximum(a, 0)
    acc_ref[...] += jnp.dot(a, b_ref[0], preferred_element_type=jnp.float32)

    @pl.when(k == pl.num_programs(3) - 1)
    def _():
        r = acc_ref[...] + bias_ref[...]
        if out_act == "relu":
            r = jnp.maximum(r, 0.0)
        elif out_act == "tanh":
            r = jnp.tanh(r)
        o_ref[0] = r.astype(o_ref.dtype)


def _pick_tn(npad):
    if npad <= 512:
        return npad
    for cand in (512, 256, 128):
        if npad % cand == 0:
            return cand
    return 128


def _pick_tk(K, tn):
    budget = max(128, (2 * 1024 * 1024) // (2 * tn))   # ~2 MiB bf16 weight tile
    if K <= budget:
        return K
    for f in range(K // 128, 0, -1):
        cand = 128 * f
        if cand <= budget and K % cand == 0:
            return cand
    return 128


def _pick_tm(M, tk, tn):
    m_align = _round_up(M, 8)
    tm = 8
    for cand in (2048, 1024, 512, 256, 128, 64, 32, 16, 8):
        if cand * tk * 2 <= (5 * 1024 * 1024) // 2 and cand * tn * 4 <= 2 * 1024 * 1024:
            tm = cand
            break
    return min(tm, m_align)


def pallas_matmul_bias(a, b, bias, n_valid, in_act="none", out_act="none",
                       out_dtype=jnp.bfloat16):
    """a: [G, M, K] bf16, b: [Gb, K, Np] bf16 (pre-packed weights, Gb in {1,G}),
    bias: [1, Np] f32.  Returns [G, M, n_valid] in out_dtype.

    `in_act` (leaky_relu / relu) is fused onto the A operand; `out_act`
    (relu / tanh) is fused into the epilogue with the bias add."""
    G, M, K = a.shape
    Gb, Kb, Np = b.shape
    if K % 128:                                   # generic fallback (unused here)
        Kp = _round_up(K, 128)
        a = jnp.pad(a, ((0, 0), (0, 0), (0, Kp - K)))
        b = jnp.pad(b, ((0, 0), (0, Kp - K), (0, 0)))
        K = Kp

    tn = _pick_tn(Np)
    tk = _pick_tk(K, tn)
    tm = _pick_tm(M, tk, tn)
    Mp = _round_up(M, tm)
    if Mp != M:
        a = jnp.pad(a, ((0, 0), (0, Mp - M), (0, 0)))

    if Gb == G:
        b_map = lambda g, i, j, k: (g, k, j)
    else:
        b_map = lambda g, i, j, k: (0, k, j)

    out = pl.pallas_call(
        functools.partial(_mm_kernel, in_act=in_act, out_act=out_act),
        out_shape=jax.ShapeDtypeStruct((G, Mp, Np), out_dtype),
        grid=(G, Mp // tm, Np // tn, K // tk),
        in_specs=[
            pl.BlockSpec((1, tm, tk), lambda g, i, j, k: (g, i, k)),
            pl.BlockSpec((1, tk, tn), b_map),
            pl.BlockSpec((1, tn), lambda g, i, j, k: (0, j)),
        ],
        out_specs=pl.BlockSpec((1, tm, tn), lambda g, i, j, k: (g, i, j)),
        scratch_shapes=[pltpu.VMEM((tm, tn), jnp.float32)],
        compiler_params=pltpu.CompilerParams(
            dimension_semantics=("parallel", "parallel", "parallel", "arbitrary")),
    )(a, b, bias)
    return out[:, :M, :n_valid]


# ----------------------- InstanceNorm2d (single pass) ------------------------

def _in_kernel(x_ref, o_ref, *, inv_hw, eps):
    x = x_ref[0].astype(jnp.float32)                      # (HW, tc)
    mean = jnp.sum(x, axis=0, keepdims=True) * inv_hw
    var = jnp.maximum(jnp.sum(x * x, axis=0, keepdims=True) * inv_hw - mean * mean, 0.0)
    o_ref[0] = ((x - mean) * lax.rsqrt(var + eps)).astype(o_ref.dtype)


def pallas_instance_norm(x, eps=1e-5):
    """nn.InstanceNorm2d (affine=False, eps=1e-5) on NHWC input (bf16 in/out)."""
    Nb, H, W, C = x.shape
    HW = H * W
    x2 = x.reshape(Nb, HW, C)
    tc = 256 if C % 256 == 0 else (128 if C % 128 == 0 else C)
    spec = pl.BlockSpec((1, HW, tc), lambda n, c: (n, 0, c))
    out = pl.pallas_call(
        functools.partial(_in_kernel, inv_hw=1.0 / HW, eps=eps),
        out_shape=jax.ShapeDtypeStruct((Nb, HW, C), x.dtype),
        grid=(Nb, C // tc),
        in_specs=[spec],
        out_specs=spec,
        compiler_params=pltpu.CompilerParams(
            dimension_semantics=("parallel", "parallel"),
            vmem_limit_bytes=48 * 1024 * 1024),
    )(x2)
    return out.reshape(Nb, H, W, C)


# ----------------------- residual + mask blend (lane-dense) -------------------

def _blend_kernel(g_ref, x_ref, m_ref, o_ref):
    g = g_ref[...].astype(jnp.float32)
    x = x_ref[...]
    m = m_ref[...]
    o_ref[...] = (g + x) * m + x * (1.0 - m)


def pallas_blend(gen, x, mask):
    """output = (gen + x) * mask + x * (1 - mask); gen bf16, x f32, mask C=1."""
    Nb, H, W, C = x.shape
    m3 = jnp.broadcast_to(mask, (Nb, H, W, C)).astype(jnp.float32)
    g = gen.reshape(-1)
    xf = x.astype(jnp.float32).reshape(-1)
    mf = m3.reshape(-1)
    total = xf.shape[0]
    L = 512
    totp = _round_up(total, L * 8)
    pad = totp - total
    if pad:
        g = jnp.pad(g, (0, pad)); xf = jnp.pad(xf, (0, pad)); mf = jnp.pad(mf, (0, pad))
    rows = totp // L
    tile = rows
    for cand in (1024, 512, 256, 128, 64, 32, 16, 8):
        if rows % cand == 0:
            tile = cand
            break
    spec = pl.BlockSpec((tile, L), lambda i: (i, 0))
    out = pl.pallas_call(
        _blend_kernel,
        out_shape=jax.ShapeDtypeStruct((rows, L), jnp.float32),
        grid=(rows // tile,),
        in_specs=[spec, spec, spec],
        out_specs=spec,
        compiler_params=pltpu.CompilerParams(dimension_semantics=("parallel",)),
    )(g.reshape(rows, L), xf.reshape(rows, L), mf.reshape(rows, L))
    return out.reshape(-1)[:total].reshape(Nb, H, W, C)


# --------------------- conv / deconv lowered to the matmul -------------------

def conv2d_k4s2p1(x, p, cout, in_act="none", out_act="none"):
    """Conv2d(k=4, s=2, p=1). x: NHWC, p: (pre-packed Wm [1,16*Cin,Np], bias)."""
    Wm, bias = p
    Nb, H, W, Cin = x.shape
    Ho, Wo = H // 2, W // 2
    xp = jnp.pad(x.astype(jnp.bfloat16), ((0, 0), (1, 1), (1, 1), (0, 0)))
    patches = [xp[:, kh:kh + 2 * Ho:2, kw:kw + 2 * Wo:2, :]
               for kh in range(4) for kw in range(4)]
    A = jnp.concatenate(patches, axis=-1).reshape(1, Nb * Ho * Wo, 16 * Cin)
    y = pallas_matmul_bias(A, Wm, bias, cout, in_act=in_act, out_act=out_act)
    return y[0].reshape(Nb, Ho, Wo, cout)


def conv_transpose2d_k4s2p1(x, p, cout, in_act="none", out_act="none",
                            out_dtype=jnp.bfloat16):
    """ConvTranspose2d(k=4,s=2,p=1) via 4-phase sub-pixel decomposition.
    p: (pre-packed Wp [4, 4*Cin, Np], bias)."""
    Wp, bias = p
    Nb, H, W, Cin = x.shape
    xp = jnp.pad(x.astype(jnp.bfloat16), ((0, 0), (1, 1), (1, 1), (0, 0)))
    offs = {0: (0, 1), 1: (1, 2)}          # padded-window start offsets per phase
    A_list = []
    for pa in (0, 1):
        for pb in (0, 1):
            parts = [xp[:, r:r + H, c:c + W, :] for r in offs[pa] for c in offs[pb]]
            A_list.append(jnp.concatenate(parts, axis=-1).reshape(Nb * H * W, 4 * Cin))
    A = jnp.stack(A_list, axis=0)                              # [4, M, 4*Cin]
    o = pallas_matmul_bias(A, Wp, bias, cout, in_act=in_act, out_act=out_act,
                           out_dtype=out_dtype)                # [4, M, cout]
    o = o.reshape(2, 2, Nb, H, W, cout)
    o = jnp.transpose(o, (2, 3, 0, 4, 1, 5)).reshape(Nb, 2 * H, 2 * W, cout)
    return o


def conv_transpose2d_k4s2p1_9tap(x, p, cout, in_act="none", out_act="none",
                                 out_dtype=jnp.bfloat16):
    """ConvTranspose2d(k=4,s=2,p=1) via merged 9-tap formulation (all 4 phases
    share one A built from the 3x3 union of input taps).  Best for small Cout.
    p: (pre-packed B [1, 9*Cin, Np>=4*Cout], bias)."""
    Wp, bias = p
    Nb, H, W, Cin = x.shape
    xp = jnp.pad(x.astype(jnp.bfloat16), ((0, 0), (1, 1), (1, 1), (0, 0)))
    parts = [xp[:, dr:dr + H, dc:dc + W, :] for dr in range(3) for dc in range(3)]
    A = jnp.concatenate(parts, axis=-1).reshape(1, Nb * H * W, 9 * Cin)
    o = pallas_matmul_bias(A, Wp, bias, 4 * cout, in_act=in_act, out_act=out_act,
                           out_dtype=out_dtype)                # [1, M, 4*cout]
    o = o[0].reshape(Nb, H, W, 2, 2, cout)
    o = jnp.transpose(o, (0, 1, 3, 2, 4, 5)).reshape(Nb, 2 * H, 2 * W, cout)
    return o


# ------------------------------- parameters ----------------------------------

def _conv_init(key, cout, cin):
    kw, kb = jax.random.split(key)
    w = jax.random.normal(kw, (cout, cin, 4, 4), jnp.float32) / ((cin * 16) ** 0.5)
    b = 0.01 * jax.random.normal(kb, (cout,), jnp.float32)
    return w, b


def _deconv_init(key, cin, cout):
    kw, kb = jax.random.split(key)
    w = jax.random.normal(kw, (cin, cout, 4, 4), jnp.float32) / ((cin * 16) ** 0.5)
    b = 0.01 * jax.random.normal(kb, (cout,), jnp.float32)
    return w, b


def init_params(key, use_lbp_network=False):
    in_ch = 5 if use_lbp_network else 4
    ngf = NGF
    down = [("dn11", in_ch, ngf), ("dn21", ngf, ngf * 2), ("dn31", ngf * 2, ngf * 4),
            ("dn41", ngf * 4, ngf * 8), ("dn51", ngf * 8, ngf * 8),
            ("dn61", ngf * 8, ngf * 8), ("dn71", ngf * 8, ngf * 8),
            ("bottle_conv", ngf * 8, ngf * 8)]
    up = [("bottle_deconv", ngf * 8, ngf * 8), ("up71", ngf * 16, ngf * 8),
          ("up61", ngf * 16, ngf * 8), ("up51", ngf * 16, ngf * 8),
          ("up41", ngf * 16, ngf * 4), ("up311", ngf * 8, ngf * 2),
          ("up21", ngf * 4, ngf * 1), ("up11", ngf * 2, 3)]
    keys = jax.random.split(key, len(down) + len(up))
    params, i = {}, 0
    for name, cin, cout in down:
        params[name] = _conv_init(keys[i], cout, cin)
        i += 1
    for name, cin, cout in up:
        params[name] = _deconv_init(keys[i], cin, cout)
        i += 1
    return params


# --- one-time (outside jit) weight packing into bf16 matmul layout -----------

def prepare_conv(w, b, cin_pad=None):
    cout, cin = int(w.shape[0]), int(w.shape[1])
    if cin_pad is not None and cin_pad > cin:
        w = jnp.pad(w, ((0, 0), (0, cin_pad - cin), (0, 0), (0, 0)))
        cin = cin_pad
    npad = _round_up(cout, 128)
    Wm = jnp.transpose(w, (2, 3, 1, 0)).reshape(16 * cin, cout)
    Wm = jnp.pad(Wm, ((0, 0), (0, npad - cout))).astype(jnp.bfloat16)
    Wm = Wm.reshape(1, 16 * cin, npad)
    bias = jnp.pad(b.astype(jnp.float32), (0, npad - cout)).reshape(1, npad)
    return (Wm, bias)


def prepare_deconv(w, b):
    cin, cout = int(w.shape[0]), int(w.shape[1])
    npad = _round_up(cout, 128)
    taps = {0: (3, 1), 1: (2, 0)}          # kernel taps per phase (matches offs)
    W_list = []
    for pa in (0, 1):
        for pb in (0, 1):
            wcols = [w[:, :, kh, kw] for kh in taps[pa] for kw in taps[pb]]
            W_list.append(jnp.concatenate(wcols, axis=0))         # [4*cin, cout]
    Wp = jnp.stack(W_list, axis=0)                                 # [4, 4*cin, cout]
    Wp = jnp.pad(Wp, ((0, 0), (0, 0), (0, npad - cout))).astype(jnp.bfloat16)
    bias = jnp.pad(b.astype(jnp.float32), (0, npad - cout)).reshape(1, npad)
    return (Wp, bias)


def prepare_deconv_9tap(w, b):
    cin, cout = int(w.shape[0]), int(w.shape[1])
    ncols = 4 * cout
    npad = _round_up(ncols, 128)
    # (phase, padded-offset) -> kernel tap; missing entries contribute zero.
    khm = {(0, 0): 3, (0, 1): 1, (1, 1): 2, (1, 2): 0}
    B = jnp.zeros((3, 3, cin, 2, 2, cout), jnp.float32)
    for (pa, dr), kh in khm.items():
        for (pb, dc), kw in khm.items():
            B = B.at[dr, dc, :, pa, pb, :].set(w[:, :, kh, kw])
    B = B.reshape(9 * cin, ncols)
    B = jnp.pad(B, ((0, 0), (0, npad - ncols))).astype(jnp.bfloat16)
    B = B.reshape(1, 9 * cin, npad)
    bias = jnp.pad(jnp.tile(b.astype(jnp.float32), 4), (0, npad - ncols)).reshape(1, npad)
    return (B, bias)


def prepare_params(params):
    P = {"dn11": prepare_conv(*params["dn11"], cin_pad=8)}
    for name in ("dn21", "dn31", "dn41", "dn51", "dn61", "dn71", "bottle_conv"):
        P[name] = prepare_conv(*params[name])
    for name in ("bottle_deconv", "up71", "up61", "up51", "up41", "up311"):
        P[name] = prepare_deconv(*params[name])
    # small-Cout deconvs use the merged 9-tap formulation
    P["up21"] = prepare_deconv_9tap(*params["up21"])
    P["up11"] = prepare_deconv_9tap(*params["up11"])
    return P


# --------------------------------- forward -----------------------------------

def image_generator_forward(P, x, lbp, mask, use_lbp_network=False):
    to_nhwc = lambda t: jnp.transpose(t, (0, 2, 3, 1))
    to_nchw = lambda t: jnp.transpose(t, (0, 3, 1, 2))
    cat = lambda a, b: jnp.concatenate([a, b], axis=-1)

    xh = to_nhwc(x)
    mh = to_nhwc(mask)
    if use_lbp_network:
        inp = jnp.concatenate([xh, to_nhwc(lbp), 1.0 - mh], axis=-1)
    else:
        inp = jnp.concatenate([xh, 1.0 - mh], axis=-1)
    # pad input channels to 8 so the im2col K (=16*Cin) is a multiple of 128
    inp = jnp.pad(inp.astype(jnp.bfloat16),
                  ((0, 0), (0, 0), (0, 0), (0, 8 - inp.shape[-1])))

    # ---- encoder (LeakyReLU fused onto the conv's A operand) ----
    dn11 = conv2d_k4s2p1(inp, P["dn11"], 64)
    dn21 = pallas_instance_norm(conv2d_k4s2p1(dn11, P["dn21"], 128, in_act="leaky_relu"))
    dn31 = pallas_instance_norm(conv2d_k4s2p1(dn21, P["dn31"], 256, in_act="leaky_relu"))
    dn41 = pallas_instance_norm(conv2d_k4s2p1(dn31, P["dn41"], 512, in_act="leaky_relu"))
    dn51 = pallas_instance_norm(conv2d_k4s2p1(dn41, P["dn51"], 512, in_act="leaky_relu"))
    dn61 = pallas_instance_norm(conv2d_k4s2p1(dn51, P["dn61"], 512, in_act="leaky_relu"))
    dn71 = pallas_instance_norm(conv2d_k4s2p1(dn61, P["dn71"], 512, in_act="leaky_relu"))

    # ---- bottleneck: LeakyReLU -> conv -> ReLU -> deconv -> IN ----
    b_mid = conv2d_k4s2p1(dn71, P["bottle_conv"], 512, in_act="leaky_relu", out_act="relu")
    bottle1 = pallas_instance_norm(conv_transpose2d_k4s2p1(b_mid, P["bottle_deconv"], 512))

    # ---- decoder (ReLU fused onto the deconv's A operand) ----
    up71 = pallas_instance_norm(conv_transpose2d_k4s2p1(
        cat(bottle1, dn71), P["up71"], 512, in_act="relu"))
    up61 = pallas_instance_norm(conv_transpose2d_k4s2p1(
        cat(up71, dn61), P["up61"], 512, in_act="relu"))
    up51 = pallas_instance_norm(conv_transpose2d_k4s2p1(
        cat(up61, dn51), P["up51"], 512, in_act="relu"))
    up41 = pallas_instance_norm(conv_transpose2d_k4s2p1(
        cat(up51, dn41), P["up41"], 256, in_act="relu"))
    # self.up31 is just ReLU, fused into up311's deconv.
    up31 = pallas_instance_norm(conv_transpose2d_k4s2p1(
        cat(up41, dn31), P["up311"], 128, in_act="relu"))
    up21 = pallas_instance_norm(conv_transpose2d_k4s2p1_9tap(
        cat(up31, dn21), P["up21"], 64, in_act="relu"))
    gen = conv_transpose2d_k4s2p1_9tap(cat(up21, dn11), P["up11"], 3,
                                       in_act="relu", out_act="tanh")

    # self.output = up11(...) + x ; output = self.output*mask + x*(1-mask)
    out = pallas_blend(gen, xh, mh)

    feats = [dn11, dn21, dn31, dn41, dn51, dn61, dn71, bottle1,
             up71, up61, up51, up41, up31, up21]
    return to_nchw(out), [to_nchw(f) for f in feats]


# ----------------------------------- main -------------------------------------

if __name__ == "__main__":
    key = jax.random.PRNGKey(0)
    kx, km, kl, kp, kc, kt = jax.random.split(key, 6)

    # Tiny self-consistency check: merged 9-tap deconv == 4-phase deconv.
    wt, bt = _deconv_init(kc, 128, 3)
    xt = jax.random.normal(kt, (1, 4, 4, 128), jnp.float32)
    d4 = conv_transpose2d_k4s2p1(xt, prepare_deconv(wt, bt), 3, out_dtype=jnp.float32)
    d9 = conv_transpose2d_k4s2p1_9tap(xt, prepare_deconv_9tap(wt, bt), 3,
                                      out_dtype=jnp.float32)
    assert float(jnp.max(jnp.abs(d4 - d9))) < 1e-2, "9-tap deconv mismatch"

    # 8 stride-2 downsamplings (dn11..dn71 + bottleneck conv) require >=256.
    N, H, W = 1, 256, 256
    x = jax.random.normal(kx, (N, 3, H, W), jnp.float32)
    mask = (jax.random.uniform(km, (N, 1, H, W)) > 0.5).astype(jnp.float32)
    lbp = jax.random.normal(kl, (N, 1, H, W), jnp.float32)  # unused (use_lbp_network=False)

    params = init_params(kp, use_lbp_network=False)
    P = prepare_params(params)   # one-time bf16 / matmul-layout weight packing

    fwd = jax.jit(image_generator_forward, static_argnames=("use_lbp_network",))
    out, feats = fwd(P, x, lbp, mask)
    jax.block_until_ready(out)
    jax.block_until_ready(feats)

    assert out.shape == (N, 3, H, W) and len(feats) == 14
    print("KERNEL_OK")
</pallas_src>

<mosaic_0001>
module attributes {stable_mosaic.version = 11 : i64} {
  func.func @_mm_kernel(%arg0: i32, %arg1: i32, %arg2: i32, %arg3: i32, %arg4: memref<1x16x512xbf16, #tpu.memory_space<vmem>>, %arg5: memref<1x512x128xbf16, #tpu.memory_space<vmem>>, %arg6: memref<1x128xf32, #tpu.memory_space<vmem>>, %arg7: memref<1x16x128xf32, #tpu.memory_space<vmem>>, %arg8: memref<16x128xf32, #tpu.memory_space<vmem>>) attributes {dimension_semantics = [#tpu.dimension_semantics<parallel>, #tpu.dimension_semantics<parallel>, #tpu.dimension_semantics<parallel>, #tpu.dimension_semantics<arbitrary>], iteration_bounds = array<i64: 4, 1, 1, 1>, scalar_prefetch = 0 : i64, scratch_operands = 1 : i64, tpu.core_type = #tpu.core_type<tc>, window_params = [{transform_indices = @transform_0, window_bounds = array<i64: 1, 16, 512>}, {transform_indices = @transform_1, window_bounds = array<i64: 1, 512, 128>}, {transform_indices = @transform_2, window_bounds = array<i64: 1, 128>}, {transform_indices = @transform_3, window_bounds = array<i64: 1, 16, 128>}]} {
    %c0_i32 = arith.constant 0 : i32
    %0 = arith.cmpi eq, %arg3, %c0_i32 : i32
    %1 = arith.extui %0 : i1 to i32
    %c0_i32_0 = arith.constant 0 : i32
    %2 = arith.cmpi ne, %1, %c0_i32_0 : i32
    scf.if %2 {
      %cst_12 = arith.constant 0.000000e+00 : f32
      %14 = vector.broadcast %cst_12 : f32 to vector<16x128xf32>
      %c0_13 = arith.constant 0 : index
      %c0_14 = arith.constant 0 : index
      %15 = vector.load %arg8[%c0_13, %c0_14] : memref<16x128xf32, #tpu.memory_space<vmem>>, vector<16x128xf32>
      tpu.vector_store %arg8[%c0_13, %c0_14], %14 {strides = array<i32>} : memref<16x128xf32, #tpu.memory_space<vmem>>, vector<16x128xf32>,
    } else {
    }
    %c0 = arith.constant 0 : index
    %c0_1 = arith.constant 0 : index
    %c0_2 = arith.constant 0 : index
    %3 = vector.load %arg4[%c0, %c0_1, %c0_2] : memref<1x16x512xbf16, #tpu.memory_space<vmem>>, vector<1x16x512xbf16>
    %4 = vector.shape_cast %3 : vector<1x16x512xbf16> to vector<16x512xbf16>
    %c0_3 = arith.constant 0 : index
    %c0_4 = arith.constant 0 : index
    %5 = vector.load %arg8[%c0_3, %c0_4] : memref<16x128xf32, #tpu.memory_space<vmem>>, vector<16x128xf32>
    %c0_5 = arith.constant 0 : index
    %c0_6 = arith.constant 0 : index
    %c0_7 = arith.constant 0 : index
    %6 = vector.load %arg5[%c0_5, %c0_6, %c0_7] : memref<1x512x128xbf16, #tpu.memory_space<vmem>>, vector<1x512x128xbf16>
    %7 = vector.shape_cast %6 : vector<1x512x128xbf16> to vector<512x128xbf16>
    %cst = arith.constant dense<0.000000e+00> : vector<16x128xf32>
    %8 = tpu.matmul %4, %7, %cst {dimension_numbers = #tpu.dot_dimension_numbers<[1], [0], [0], [1], [0, 0, 1, 1], [], []>} : vector<16x512xbf16>, vector<512x128xbf16>, vector<16x128xf32> -> vector<16x128xf32>
    %9 = arith.addf %5, %8 : vector<16x128xf32>
    %c0_8 = arith.constant 0 : index
    %c0_9 = arith.constant 0 : index
    %10 = vector.load %arg8[%c0_8, %c0_9] : memref<16x128xf32, #tpu.memory_space<vmem>>, vector<16x128xf32>
    tpu.vector_store %arg8[%c0_8, %c0_9], %9 {strides = array<i32>} : memref<16x128xf32, #tpu.memory_space<vmem>>, vector<16x128xf32>,
    %c0_i32_10 = arith.constant 0 : i32
    %11 = arith.cmpi eq, %arg3, %c0_i32_10 : i32
    %12 = arith.extui %11 : i1 to i32
    %c0_i32_11 = arith.constant 0 : i32
    %13 = arith.cmpi ne, %12, %c0_i32_11 : i32
    scf.if %13 {
      %c0_12 = arith.constant 0 : index
      %c0_13 = arith.constant 0 : index
      %14 = vector.load %arg8[%c0_12, %c0_13] : memref<16x128xf32, #tpu.memory_space<vmem>>, vector<16x128xf32>
      %c0_14 = arith.constant 0 : index
      %c0_15 = arith.constant 0 : index
      %15 = vector.load %arg6[%c0_14, %c0_15] : memref<1x128xf32, #tpu.memory_space<vmem>>, vector<1x128xf32>
      %16 = vector.broadcast %15 : vector<1x128xf32> to vector<16x128xf32>
      %17 = arith.addf %14, %16 : vector<16x128xf32>
      %c0_16 = arith.constant 0 : index
      %c0_17 = arith.constant 0 : index
      %c0_18 = arith.constant 0 : index
      %18 = vector.load %arg7[%c0_16, %c0_17, %c0_18] : memref<1x16x128xf32, #tpu.memory_space<vmem>>, vector<1x16x128xf32>
      %19 = vector.shape_cast %18 : vector<1x16x128xf32> to vector<16x128xf32>
      %20 = vector.shape_cast %17 : vector<16x128xf32> to vector<1x16x128xf32>
      tpu.vector_store %arg7[%c0_16, %c0_17, %c0_18], %20 {strides = array<i32>} : memref<1x16x128xf32, #tpu.memory_space<vmem>>, vector<1x16x128xf32>,
    } else {
    }
    return
  }
  func.func @transform_0(%arg0: i32, %arg1: i32, %arg2: i32, %arg3: i32) -> (i32, i32, i32) {
    %c0_i32 = arith.constant 0 : i32
    return %arg0, %arg1, %arg3 : i32, i32, i32
  }
  func.func @transform_1(%arg0: i32, %arg1: i32, %arg2: i32, %arg3: i32) -> (i32, i32, i32) {
    %c0_i32 = arith.constant 0 : i32
    return %arg0, %arg3, %arg2 : i32, i32, i32
  }
  func.func @transform_2(%arg0: i32, %arg1: i32, %arg2: i32, %arg3: i32) -> (i32, i32) {
    %c0_i32 = arith.constant 0 : i32
    %c0_i32_0 = arith.constant 0 : i32
    return %c0_i32, %arg2 : i32, i32
  }
  func.func @transform_3(%arg0: i32, %arg1: i32, %arg2: i32, %arg3: i32) -> (i32, i32, i32) {
    %c0_i32 = arith.constant 0 : i32
    return %arg0, %arg1, %arg2 : i32, i32, i32
  }
}

</mosaic_0001>

<bundles_post_ra>
// kernel: tpu_custom_call.1
= control target key start
LH: loop header
LB: loop body
LE: loop exit
PB: predicated region body
PF: predicated region fallthrough
CT: control target
= control target key end

     0   :  { %8 = vsyncpa [#allocation4], 0  ;;  %s1495_s0 = inlined_call_operand.hbm [shape: bf16[4,16,512], index: 0, kind: input, shape index: {}]   ;;  %s1496_s1 = inlined_call_operand.hbm [shape: bf16[4,512,128], index: 1, kind: input, shape index: {}]   ;;  %s1497_s2 = inlined_call_operand.vmem [shape: f32[1,128], index: 2, kind: input, shape index: {}]   ;;  %s1498_s3 = inlined_call_operand.hbm [shape: f32[4,16,128], index: 3, kind: output, shape index: {}]  }
   0x1   :  { %10 = vsyncpa [#allocation4 + $0x1], 0 }
   0x2   :  { %11 = vsyncpa [#allocation7], 0 }
   0x3   :  { %13 = vsyncpa [#allocation7 + $0x1], 0 }
   0x4   :  { %14 = vsyncpa [#allocation5], 0 }
   0x5   :  { %16 = vsyncpa [#allocation5 + $0x1], 0  ;;  %s1228_s12 = smov 0   ;;  %s1230_s13 = smov 0  }
   0x6   :  { %s1232_s14 = smov 0   ;;  %s1234_s15 = smov 0  }
   0x7   :  { %s1236_s16 = smov 0   ;;  %s1238_s17 = smov 0  }
   0x8 LB: > { %s836_s18 = sadd.s32 4294967295, %s1197_s17   ;;  %s837_s19 = sadd.s32 4294967294, %s1197_s17   ;;  %s1197_s17 = sphi %s1238_s17, %s22_s17   ;;  %s1193_s16 = sphi %s1236_s16, %s1515_s16   ;;  %s1189_s15 = sphi %s1234_s15, %s1514_s15   ;;  %s1185_s14 = sphi %s1232_s14, %s1513_s14   ;;  %s1181_s13 = sphi %s1230_s13, %s1512_s13   ;;  %s1177_s12 = sphi %s1228_s12, %s1511_s12  }
   0x9   : > { %s48_s20 = sadd.s32 1, %s1193_s16  ;;  %s59_s21 = sadd.s32 1, %s1185_s14 }
   0xa   : > { %p50_p0 = scmp.ge.s32.totalorder %s48_s20, 4  ;;  %p66_p1 = scmp.ne.s32.totalorder %s1185_s14, %s1181_s13 }
   0xb   : > { %p67_p2 = scmp.eq.s32.totalorder %s1197_s17, 0  ;;  %p72_p3 = scmp.ne.s32.totalorder %s1181_s13, %s1177_s12 }
   0xc   : > { %s1517_s20 = smov (%p50_p0, %s48_s20), 0  ;;  %p73_p5 = scmp.eq.s32.totalorder %s836_s18, 0 }
   0xd   : > { %p1269_p4 = por %p67_p2, %p66_p1  ;;  %s52_s23 = ssub.s32 %s1193_s16, %s1517_s20 }
   0xe   : > { %p156_p6 = scmp.eq.s32.totalorder %s836_s18, 3  ;;  %p57_p7 = scmp.eq.s32.totalorder %s52_s23, 0 }
   0xf   : > { %p1275_p8 = por %p73_p5, %p72_p3  ;;  %p162_p10 = scmp.eq.s32.totalorder %s837_s19, 3 }
  0x10   : > { %p1279_p9 = por %p156_p6, %p66_p1  ;;  %p957_p12 = scmp.lt.s32.totalorder %s1197_s17, 4 }
  0x11   : > { %s1502_s24 = scalar_select %p1275_p8, 1, 0 }
  0x12   : > { %s1503_s25 = scalar_select %p1279_p9, 1, 0 }
  0x13   : > { %s1284_s26 = scalar_select %p57_p7, %s1185_s14, %s59_s21  }
  0x14   : > { %p1286_p11 = por %p162_p10, %p72_p3  ;;  %s1292_s28 = sand.u32 1, %s1185_s14  }
  0x15   : > { %s841_s29 = sshll.u32 %s1292_s28, 5  ;;  %s893_s30 = sshll.u32 %s1193_s16, 9 }
  0x16   : > { %s1504_s27 = scalar_select %p1286_p11, 1, 0 }
  0x17   : > { %s1299_s6 = scalar_lea.hbm %s1495_s0, %s893_s30  ;;  %s192_s7 = scalar_lea.vmem [#allocation3], %s841_s29 }
  0x18   : > { %s204_s8 = sshll.u32 %s192_s7, 4  ;;  %p1305_p13 = pnand %p957_p12, %p1269_p4  ;;  %s1301_s8 = int_to_ptr.vmem [resolvable:$true] %s204_s8 }
  0x19   : > { %s189_s10 = scalar_lea.sflag [#allocation4], %s1292_s28  ;;  %s1051_s11 = scalar_lea.hbm %s1299_s6, 512 }
  0x1a   : > { %p1052_p1 = scmp.ne.s32.totalorder %s1299_s6, %s1051_s11  ;;  %p1053_p2 = pneg %p1305_p13 }
  0x1b   : > { %s1056_s21 = scalar_lea.hbm %s1495_s0, 2048  ;;  %p1057_p4 = scmp.lt.u32.totalorder %s1299_s6, %s1495_s0 }
  0x1c   : > { %p1054_p3 = pnand %p1053_p2, %p1052_p1  ;;  %p1058_p6 = scmp.lt.u32.totalorder %s1056_s21, %s1051_s11 }
  0x1d   : > { %p1060_p10 = scmp.lt.u32.totalorder %s1051_s11, %s1299_s6 }
  0x1e   : > { %p1055_p5 = pneg %p1054_p3  ;;  %p1059_p7 = por %p1058_p6, %p1057_p4 }
  0x20   : > { %p1061_p12 = por %p1060_p10, %p1059_p7 }
  0x22   : > { %p1062_p0 = pnand %p1061_p12, %p1055_p5 }
  0x24   : > { %1065 = shalt.err (!%p1062_p0)
}
  0x25   : > { %s1066_s29 = scalar_lea.vmem %s1301_s8, 512  ;;  %s1199_s30 = smov [#allocation3]  }
  0x26   : > { %p1067_p1 = scmp.ne.s32.totalorder %s1301_s8, %s1066_s29  ;;  %s1071_s4 = sshll.u32 %s1199_s30, 4  ;;  %s1072_s4 = int_to_ptr.vmem [resolvable:$false] %s1071_s4 }
  0x27   : > { %s1073_s5 = scalar_lea.vmem %s1072_s4, 1024  ;;  %p1074_p9 = scmp.lt.s32.totalorder %s1301_s8, %s1072_s4 }
  0x28   : > { %p1069_p3 = pnand %p1067_p1, %p1053_p2  ;;  %p1075_p4 = scmp.lt.s32.totalorder %s1073_s5, %s1066_s29 }
  0x2a   : > { %p1070_p11 = pneg %p1069_p3  ;;  %p1076_p6 = por %p1075_p4, %p1074_p9 }
  0x2c   : > { %p1077_p7 = pnand %p1076_p6, %p1070_p11 }
  0x2e   : > { %1080 = shalt.err (!%p1077_p7)
}
  0x2f   : > { %s1200_s7 = smov 256   ;;  %s1201_s11 = smov 16  }
  0x30   : > { %949 = dma.hbm_to_vmem [thread:$0]  (!%p1305_p13), %s1299_s6, 512, %s1301_s8, %s189_s10, %s1200_s7, %s1200_s7, %s1201_s11  }
  0x31   : > { %p236_p0 = scmp.lt.s32.totalorder %s1197_s17, 5  ;;  %s844_s18 = sshll.u32 %s1292_s28, 8 }
  0x32   : > { %s894_s19 = sshll.u32 %s1193_s16, 12  ;;  %p1506_p9 = scmp.ge.s32.totalorder %s1197_s17, 1 }
  0x33   : > { %s1350_s29 = scalar_lea.hbm %s1496_s1, %s894_s19  ;;  %s218_s30 = scalar_lea.vmem [#allocation6], %s844_s18 }
  0x34   : > { %p1343_p11 = pnand %p1506_p9, %p236_p0  ;;  %s228_s4 = sshll.u32 %s218_s30, 4  ;;  %s1352_s4 = int_to_ptr.vmem [resolvable:$true] %s228_s4 }
  0x35   : > { %s215_s6 = scalar_lea.sflag [#allocation7], %s1292_s28  ;;  %s1081_s8 = scalar_lea.hbm %s1350_s29, 4096 }
  0x36   : > { %p1082_p5 = scmp.ne.s32.totalorder %s1350_s29, %s1081_s8  ;;  %s1086_s7 = scalar_lea.hbm %s1496_s1, 16384 }
  0x37   : > { %p1087_p1 = scmp.lt.u32.totalorder %s1350_s29, %s1496_s1  ;;  %p1088_p3 = scmp.lt.u32.totalorder %s1086_s7, %s1081_s8 }
  0x38   : > { %p1084_p10 = pnand %p1082_p5, %p1053_p2  ;;  %p1090_p6 = scmp.lt.u32.totalorder %s1081_s8, %s1350_s29 }
  0x39   : > { %p1089_p4 = por %p1088_p3, %p1087_p1 }
  0x3a   : > { %p1085_p12 = pneg %p1084_p10 }
  0x3b   : > { %p1091_p7 = por %p1090_p6, %p1089_p4 }
  0x3d   : > { %p1092_p0 = pnand %p1091_p7, %p1085_p12 }
  0x3f   : > { %1095 = shalt.err (!%p1092_p0)
}
  0x40   : > { %s1096_s18 = scalar_lea.vmem %s1352_s4, 4096  ;;  %s1202_s22 = smov [#allocation6]  }
  0x41   : > { %p1097_p9 = scmp.ne.s32.totalorder %s1352_s4, %s1096_s18  ;;  %s1101_s23 = sshll.u32 %s1202_s22, 4  ;;  %s1102_s23 = int_to_ptr.vmem [resolvable:$false] %s1101_s23 }
  0x42   : > { %s1103_s30 = scalar_lea.vmem %s1102_s23, 8192  ;;  %p1104_p8 = scmp.lt.s32.totalorder %s1352_s4, %s1102_s23 }
  0x43   : > { %p1099_p5 = pnand %p1097_p9, %p1053_p2  ;;  %p1105_p1 = scmp.lt.s32.totalorder %s1103_s30, %s1096_s18 }
  0x45   : > { %p1100_p10 = pneg %p1099_p5  ;;  %p1106_p3 = por %p1105_p1, %p1104_p8 }
  0x47   : > { %p1107_p4 = pnand %p1106_p3, %p1100_p10 }
  0x49   : > { %1110 = shalt.err (!%p1107_p4)
}
  0x4a   : > { %s1203_s8 = smov 64   ;;  %s1204_s10 = smov 4  }
  0x4b   : > { %952 = dma.hbm_to_vmem [thread:$0]  (!%p1305_p13), %s1350_s29, 4096, %s1352_s4, %s215_s6, %s1203_s8, %s1203_s8, %s1204_s10  }
  0x4c   : > { %240 = sbr.rel (%p1343_p11) target bundleno = 358 (0x166), region = 32  ;;  %s1383_s5 = sand.u32 (!%p1343_p11), 1, %s1181_s13  }
  0x4d   : > { %s848_s7 = sshll.u32 (!%p1343_p11), %s1383_s5, 5  ;;  %s243_s11 = scalar_lea.sflag (!%p1343_p11), [#allocation4], %s1383_s5 }
  0x4e   : > { %s1387_s19 = scalar_lea.vmem (!%p1343_p11), [#allocation3], %s848_s7  ;;  %p1508_p8 = scmp.ne.s32.totalorder (!%p1343_p11), %s1502_s24, 0 }
  0x53   : > { %1164 = dma.done.wait (%p1508_p8), %s243_s11, 512  }
  0x54   : > { %1166 = vsyncadd (%p1508_p8), %s243_s11, 4294966784  ;;  %s849_s28 = sshll.u32 %s1383_s5, 8  ;;  %s252_s9 = scalar_lea.sflag [#allocation7], %s1383_s5 }
  0x55   : > { %s1395_s21 = scalar_lea.vmem [#allocation6], %s849_s28 }
  0x56   : > { %1168 = dma.done.wait (%p1508_p8), %s252_s9, 4096  }
  0x57   : > { %1170 = vsyncadd (%p1508_p8), %s252_s9, 4294963200  ;;  %v1013_v0 = vld [vmem:[%s1395_s21 + $0x40] sm:$0xff]   ;;  %v1017_v4 = vld [vmem:[%s1395_s21 + $0x48] sm:$0xff]   ;;  %s850_s24 = sshll.u32 %s1383_s5, 4  ;;  %s895_s22 = sshll.u32 %s1189_s15, 8 }
  0x58   : > { %v1014_v1 = vld [vmem:[%s1395_s21 + $0xc0] sm:$0xff]   ;;  %896 = vmatprep.subr.bf16.mxu0 %v1013_v0  ;;  %v1018_v5 = vld [vmem:[%s1395_s21 + $0xc8] sm:$0xff]   ;;  %v1021_v8 = vld [vmem:[%s1395_s21 + $0x50] sm:$0xff]   ;;  %s285_s6 = scalar_lea.vmem [#allocation8], %s850_s24  ;;  %s1447_s8 = scalar_lea.hbm %s1498_s3, %s895_s22 }
  0x59   : > { %v1015_v2 = vld [vmem:[%s1395_s21] sm:$0xff]   ;;  %918 = vmatprep.subr.bf16.mxu1 %v1014_v1  ;;  %v1019_v6 = vld [vmem:[%s1395_s21 + $0x8] sm:$0xff]   ;;  %v1022_v9 = vld [vmem:[%s1395_s21 + $0xd0] sm:$0xff]   ;;  %s701_s18 = sshll.u32 %s285_s6, 4  ;;  %s685_s10 = scalar_lea.sflag [#allocation5], %s1383_s5  ;;  %s1442_s18 = int_to_ptr.vmem [resolvable:$true] %s701_s18 }
  0x5a   : > { %v1016_v3 = vld [vmem:[%s1395_s21 + $0x80] sm:$0xff]   ;;  %897 = vmatpush3.bf16.msra.mxu0 %v1015_v2  ;;  %v1020_v7 = vld [vmem:[%s1395_s21 + $0x88] sm:$0xff]   ;;  %v1023_v10 = vld [vmem:[%s1395_s21 + $0x10] sm:$0xff]   ;;  %s1111_s7 = scalar_lea.vmem %s1442_s18, 256  ;;  %p1509_p2 = scmp.ne.s32.totalorder %s1503_s25, 0 }
  0x5b   : > { %919 = vmatpush3.bf16.msra.mxu1 %v1016_v3  ;;  %898 = vmatprep.subr.bf16.mxu0 %v1017_v4  ;;  %v1024_v11 = vld [vmem:[%s1395_s21 + $0x90] sm:$0xff]   ;;  %v1025_v12 = vld [vmem:[%s1395_s21 + $0x58] sm:$0xff]   ;;  %v1029_v16 = vld [vmem:[%s1395_s21 + $0x60] sm:$0xff]   ;;  %p1112_p13 = scmp.ne.s32.totalorder %s1442_s18, %s1111_s7  ;;  %s1205_s15 = smov [#allocation8]  }
  0x5c   : > { %920 = vmatprep.subr.bf16.mxu1 %v1018_v5  ;;  %v1026_v13 = vld [vmem:[%s1395_s21 + $0xd8] sm:$0xff]   ;;  %v1030_v17 = vld [vmem:[%s1395_s21 + $0xe0] sm:$0xff]   ;;  %v1033_v20 = vld [vmem:[%s1395_s21 + $0x68] sm:$0xff]   ;;  %s1115_s11 = sshll.u32 %s1205_s15, 4  ;;  %s1116_s11 = int_to_ptr.vmem [resolvable:$false] %s1115_s11 }
  0x5d   : > { %v1027_v14 = vld [vmem:[%s1395_s21 + $0x18] sm:$0xff]   ;;  %v1031_v18 = vld [vmem:[%s1395_s21 + $0x20] sm:$0xff]   ;;  %v1034_v21 = vld [vmem:[%s1395_s21 + $0xe8] sm:$0xff]   ;;  %p1113_p11 = pnand %p1112_p13, %p1509_p2  ;;  %p1118_p6 = scmp.lt.s32.totalorder %s1442_s18, %s1116_s11 }
  0x5e   : > { %899 = vmatpush3.bf16.msra.mxu0 %v1019_v6  ;;  %v1028_v15 = vld [vmem:[%s1395_s21 + $0x98] sm:$0xff]   ;;  %v1032_v19 = vld [vmem:[%s1395_s21 + $0xa0] sm:$0xff]   ;;  %v1035_v22 = vld [vmem:[%s1395_s21 + $0x28] sm:$0xff]  }
  0x5f   : > { %921 = vmatpush3.bf16.msra.mxu1 %v1020_v7  ;;  %900 = vmatprep.subr.bf16.mxu0 %v1021_v8  ;;  %v1036_v23 = vld [vmem:[%s1395_s21 + $0xa8] sm:$0xff]   ;;  %v1037_v24 = vld [vmem:[%s1395_s21 + $0x70] sm:$0xff]   ;;  %v1041_v28 = vld [vmem:[%s1395_s21 + $0x78] sm:$0xff]   ;;  %p1114_p12 = pneg %p1113_p11 }
  0x60   : > { %922 = vmatprep.subr.bf16.mxu1 %v1022_v9  ;;  %v1038_v25 = vld [vmem:[%s1395_s21 + $0xf0] sm:$0xff]   ;;  %v1042_v29 = vld [vmem:[%s1395_s21 + $0xf8] sm:$0xff]   ;;  %v887_v45 = vld [vmem:[%s1497_s2] ss:$0 sm:$0xff] }
  0x61   : > { %v1039_v26 = vld [vmem:[%s1395_s21 + $0x30] sm:$0xff]   ;;  %v1043_v30 = vld [vmem:[%s1395_s21 + $0x38] sm:$0xff]  }
  0x62   : > { %901 = vmatpush3.bf16.msra.mxu0 %v1023_v10  ;;  %v1040_v27 = vld [vmem:[%s1395_s21 + $0xb0] sm:$0xff]   ;;  %v1044_v31 = vld [vmem:[%s1395_s21 + $0xb8] sm:$0xff]  }
  0x63   : > { %923 = vmatpush3.bf16.msra.mxu1 %v1024_v11  ;;  %902 = vmatprep.subr.bf16.mxu0 %v1025_v12  ;;  %v1045_v32 = vld [vmem:[%s1387_s19] ss:$16 sps:$4 sm:$0xff]   ;;  %v1047_v33 = vld [vmem:[%s1387_s19 + $0x4] ss:$16 sps:$4 sm:$0xff]   ;;  %v1048_v34 = vld [vmem:[%s1387_s19 + $0x8] ss:$16 sps:$4 sm:$0xff]  }
  0x64   : > { %924 = vmatprep.subr.bf16.mxu1 %v1026_v13  ;;  %v1050_v35 = vld [vmem:[%s1387_s19 + $0xc] ss:$16 sps:$4 sm:$0xff]   ;;  %614 = vmatprep.mubr.bf16.mxu0 %v1047_v33  ;;  %s1117_s19 = scalar_lea.vmem %s1116_s11, 512 }
  0x65   : > { %655 = vmatprep.mubr.bf16.mxu1 %v1050_v35  ;;  %p1119_p7 = scmp.lt.s32.totalorder %s1117_s19, %s1111_s7 }
  0x66   : > { %903 = vmatpush3.bf16.msra.mxu0 %v1027_v14 }
  0x67   : > { %925 = vmatpush3.bf16.msra.mxu1 %v1028_v15  ;;  %904 = vmatprep.subr.bf16.mxu0 %v1029_v16  ;;  %p1120_p0 = por %p1119_p7, %p1118_p6 }
  0x68   : > { %926 = vmatprep.subr.bf16.mxu1 %v1030_v17 }
  0x69   : > { %p1121_p9 = pnand %p1120_p0, %p1114_p12 }
  0x6a   : > { %905 = vmatpush3.bf16.msra.mxu0 %v1031_v18 }
  0x6b   : > { %927 = vmatpush3.bf16.msra.mxu1 %v1032_v19  ;;  %906 = vmatprep.subr.bf16.mxu0 %v1033_v20 }
  0x6c   : > { %928 = vmatprep.subr.bf16.mxu1 %v1034_v21 }
  0x6e   : > { %907 = vmatpush3.bf16.msra.mxu0 %v1035_v22 }
  0x6f   : > { %929 = vmatpush3.bf16.msra.mxu1 %v1036_v23  ;;  %908 = vmatprep.subr.bf16.mxu0 %v1037_v24 }
  0x70   : > { %930 = vmatprep.subr.bf16.mxu1 %v1038_v25 }
  0x72   : > { %909 = vmatpush3.bf16.msra.mxu0 %v1039_v26 }
  0x73   : > { %931 = vmatpush3.bf16.msra.mxu1 %v1040_v27  ;;  %910 = vmatprep.subr.bf16.mxu0 %v1041_v28 }
  0x74   : > { %932 = vmatprep.subr.bf16.mxu1 %v1042_v29 }
  0x76   : > { %911 = vmatpush3.bf16.msra.mxu0 %v1043_v30 }
  0x77   : > { %933 = vmatpush3.bf16.msra.mxu1 %v1044_v31 }
  0x79   : > { %615 = vmatmul.mubr.bf16.vlgmr.msra.gmra.mrb[0].mxu0 %v1045_v32 }
  0x7a   : > { %656 = vmatmul.mubr.bf16.vlgmr.msra.gmra.mrb[0].mxu1 %v1048_v34 }
 0x14c   : > { %v912_v36 = vpop.f32.mrb[0].mxu0 }
 0x14d   : > { %v934_v37 = vpop.f32.mrb[0].mxu1  ;;  %v913_v38 = vpop.f32.mrb[1].mxu0 }
 0x14e   : > { %v914_v39 = vadd.f32 %v913_v38, %v912_v36  ;;  %v935_v40 = vpop.f32.mrb[1].mxu1  ;;  %v915_v41 = vpop.f32.mrb[2].mxu0 }
 0x14f   : > { %v936_v42 = vadd.f32 %v935_v40, %v934_v37  ;;  %v937_v43 = vpop.f32.mrb[2].mxu1  ;;  %v916_v44 = vpop.f32.mrb[3].mxu0 }
 0x150   : > { %v917_v46 = vadd.f32 %v916_v44, %v915_v41  ;;  %v938_v47 = vpop.f32.mrb[3].mxu1 }
 0x151   : > { %v658_v48 = vadd.f32 %v936_v42, %v914_v39  ;;  %v939_v49 = vadd.f32 %v938_v47, %v937_v43 }
 0x153   : > { %v680_v50 = vadd.f32 %v887_v45, %v658_v48  ;;  %v661_v51 = vadd.f32 %v939_v49, %v917_v46 }
 0x155   : > { %682 = vst [vmem:[%s285_s6] sm:$0xff] %v680_v50  ;;  %v681_v52 = vadd.f32 %v887_v45, %v661_v51 }
 0x157   : > { %683 = vst [vmem:[%s285_s6 + $0x8] sm:$0xff] %v681_v52 }
 0x158   : > { %1124 = shalt.err (!%p1121_p9)
}
 0x159   : > { %s1125_s28 = scalar_lea.hbm %s1447_s8, 256  ;;  %s1129_s24 = scalar_lea.hbm %s1498_s3, 1024 }
 0x15a   : > { %p1126_p5 = scmp.ne.s32.totalorder %s1447_s8, %s1125_s28  ;;  %p1130_p3 = scmp.lt.u32.totalorder %s1447_s8, %s1498_s3 }
 0x15b   : > { %p1131_p4 = scmp.lt.u32.totalorder %s1129_s24, %s1125_s28  ;;  %p1133_p13 = scmp.lt.u32.totalorder %s1125_s28, %s1447_s8 }
 0x15c   : > { %p1127_p10 = pnand %p1126_p5, %p1509_p2 }
 0x15d   : > { %p1132_p8 = por %p1131_p4, %p1130_p3 }
 0x15e   : > { %p1128_p1 = pneg %p1127_p10 }
 0x15f   : > { %p1134_p11 = por %p1133_p13, %p1132_p8 }
 0x161   : > { %p1135_p12 = pnand %p1134_p11, %p1128_p1 }
 0x163   : > { %1138 = shalt.err (!%p1135_p12)
}
 0x164   : > { %s1206_s6 = smov 128   ;;  %s1207_s22 = smov 8  }
 0x165   : > { %944 = dma.vmem_to_hbm [thread:$0]  (%p1509_p2), %s1442_s18, 256, %s1447_s8, %s685_s10, %s1206_s6, %s1206_s6, %s1207_s22  }
 0x166 PF: > { %p958_p6 = scmp.ge.s32.totalorder %s1197_s17, 2  ;;  %s716_s23 = sand.u32 1, %s1177_s12  }
 0x167   : > { %p1510_p7 = scmp.ne.s32.totalorder %s1504_s27, 0  ;;  %s717_s30 = scalar_lea.sflag [#allocation5], %s716_s23 }
 0x169   : > { %p954_p0 = pnand %p958_p6, %p1510_p7 }
 0x16b   : > { %1172 = dma.done.wait (!%p954_p0), %s717_s30, 256  }
 0x16c   : > { %1174 = vsyncadd (!%p954_p0), %s717_s30, 4294967040  ;;  %s22_s17 = sadd.s32 1, %s1197_s17   ;;  %s1511_s12 = smov %s1181_s13 }
 0x16d   : > { %p19_p9 = scmp.ge.s32.totalorder %s22_s17, 6   ;;  %s1512_s13 = smov %s1185_s14 }
 0x16e   : > { %s1513_s14 = smov %s1284_s26  ;;  %s1514_s15 = smov %s1193_s16 }
 0x16f   : > { %s1515_s16 = smov %s1517_s20  ;;  %21 = sbr.rel (!%p19_p9) target bundleno = 8 (0x8), region = 101 }
 0x176   :  { %722 = vsyncpa [#allocation4], 1 }
 0x177   :  { %724 = vsyncpa [#allocation4 + $0x1], 1 }
 0x178   :  { %725 = vsyncpa [#allocation7], 1 }
 0x179   :  { %727 = vsyncpa [#allocation7 + $0x1], 1 }
 0x17a   :  { %728 = vsyncpa [#allocation5], 1 }
 0x17b   :  { %730 = vsyncpa [#allocation5 + $0x1], 1 }

</bundles_post_ra>
